<compile_context>
chip_gen: v5e
topology: v5e:2x2
jax: 0.10.0
libtpu: 0.0.40
codegen_flags: <defaults>
</compile_context>

<pallas_src>
import jax
import jax.numpy as jnp
from jax.experimental import pallas as pl
from jax.experimental.pallas import tpu as pltpu

EPS = 1e-3                                   # CharbonnierLoss eps
GAUSS_1D = (0.05, 0.25, 0.4, 0.25, 0.05)     # angRes == 5 kernel


def _gauss_matrix(n):
    """M such that (M @ v)[i] = sum_a k[a] * v[clip(i + a - 2, 0, n-1)],
    i.e. 1-D gaussian filtering with replicate padding (setup glue, runs in JAX)."""
    k = jnp.asarray(GAUSS_1D, dtype=jnp.float32)
    i = jnp.arange(n)[:, None]
    cols = jnp.arange(n)[None, :]
    M = jnp.zeros((n, n), dtype=jnp.float32)
    for a in range(5):
        idx = jnp.clip(i + a - 2, 0, n - 1)
        M = M + k[a] * (idx == cols).astype(jnp.float32)
    return M


def _macpi_kernel(x_ref, y_ref, ml_ref, mr_ref, out_ref):
    b, h, w = x_ref.shape
    # Cast after the DMA so HBM traffic stays at the input dtype width.
    d = x_ref[...].astype(jnp.float32) - y_ref[...].astype(jnp.float32)      # (b,H,W)

    # e = d @ M_R per image (contract the lane axis of d with rows of M_R).
    e = jnp.einsum('bhv,vw->bhw', d, mr_ref[...],
                   preferred_element_type=jnp.float32)                       # (b,H,W)

    # f = M_L @ e per image: broadcast M_L over the batch dim and use a batched
    # matmul (batch dims on both operands => no kron, no transpose, only useful MACs).
    mlb = jnp.broadcast_to(ml_ref[...], (b, h, h))
    f = jnp.einsum('bhk,bkw->bhw', mlb, e,
                   preferred_element_type=jnp.float32)                       # (b,H,W)

    # Charbonnier on (lap(x) - lap(y)) = d - f, fused into the reduction.
    lap = d - f
    charb = jnp.sqrt(lap * lap + EPS * EPS)

    # Per-step partial: collapse batch + sublane axes only; the lane (W) reduction
    # and the cross-block reduction happen outside the kernel.
    out_ref[...] = jnp.sum(charb, axis=(0, 1), keepdims=True)                # (1,1,W)


def _vmem_budget():
    """Generation-aware VMEM request + block-size budget."""
    try:
        cap = int(pltpu.get_tpu_info().vmem_capacity_bytes)
    except Exception:
        cap = 64 * 1024 * 1024                       # conservative: v7x per-core VMEM
    limit = min((cap * 3) // 4, 100 * 1024 * 1024)   # scoped VMEM we request
    block_budget = int(limit * 0.55)                 # headroom for compiler scratch/spill
    return limit, block_budget


def _choose_batch_block(n, h, w, elem_size, block_budget):
    """Pick a divisor b of n: fits the VMEM budget (double-buffered inputs, constant
    matrices, ~5 live f32 temporaries), keeps >= 4 grid steps when possible."""
    def vmem_est(b):
        return (2 * 2 * b * h * w * elem_size        # x & y blocks, 2 buffers each
                + 2 * 2 * (h * h + w * w) * 4        # M_L / M_R (assume 2 buffers)
                + 4 * b * (4 * h * w + h * h)        # live f32 temporaries (d,e,mlb,f,charb)
                + 2 * 2 * w * 4)                     # output partial blocks
    divisors = [b for b in range(1, n + 1)
                if n % b == 0 and vmem_est(b) <= block_budget]
    if not divisors:
        return 1
    pipelined = [b for b in divisors if n // b >= 4]
    pool = pipelined if pipelined else divisors
    return max(pool)


def macpi_loss(x, y, ang_res=5):
    assert ang_res == 5, "only angRes == 5 defines the gaussian kernel"
    N, C, H, W = x.shape
    assert C == 1, "conv2d kernel is (1,1,5,5) with groups=1 => single channel"

    # Keep the native dtype in HBM (cast inside the kernel after the DMA).
    x3 = x.reshape(N, H, W)
    y3 = y.reshape(N, H, W)

    A = _gauss_matrix(H)                                # row-direction gaussian
    B = _gauss_matrix(W)                                # col-direction gaussian
    r = (jnp.arange(H) % 2 == 0).astype(jnp.float32)    # even-row mask
    c = (jnp.arange(W) % 2 == 0).astype(jnp.float32)    # even-col mask
    M_L = 2.0 * jnp.dot(A * r[None, :], A)              # 2 * A @ diag(r) @ A
    M_R = 2.0 * jnp.dot(B.T * c[None, :], B.T)          # 2 * B^T @ diag(c) @ B^T

    limit, budget = _vmem_budget()
    b_blk = _choose_batch_block(N, H, W, jnp.dtype(x.dtype).itemsize, budget)
    n_blocks = N // b_blk

    partials = pl.pallas_call(
        _macpi_kernel,
        out_shape=jax.ShapeDtypeStruct((n_blocks, 1, W), jnp.float32),
        grid=(n_blocks,),
        in_specs=[
            pl.BlockSpec((b_blk, H, W), lambda i: (i, 0, 0)),
            pl.BlockSpec((b_blk, H, W), lambda i: (i, 0, 0)),
            # Grid-constant operands (index map (0,0)); after removing the kron
            # they are tiny, so single-buffering them is not worth the complexity.
            pl.BlockSpec((H, H), lambda i: (0, 0)),
            pl.BlockSpec((W, W), lambda i: (0, 0)),
        ],
        out_specs=pl.BlockSpec((1, 1, W), lambda i: (i, 0, 0)),
        compiler_params=pltpu.CompilerParams(
            dimension_semantics=("parallel",),   # independent partial per block
            vmem_limit_bytes=limit),
    )(x3, y3, M_L, M_R)

    # Final (tiny) reduction and mean normalization outside the kernel.
    return jnp.sum(partials) * (1.0 / float(N * C * H * W))


def _ref_macpi_loss(x, y):
    """Pure-JAX reference mirroring the PyTorch module (for validation)."""
    k = jnp.asarray(GAUSS_1D, dtype=jnp.float32)
    K = jnp.outer(k, k)

    def conv_gauss(img):  # img: (N, 1, H, W)
        H, W = img.shape[2], img.shape[3]
        p = jnp.pad(img, ((0, 0), (0, 0), (2, 2), (2, 2)), mode="edge")
        out = jnp.zeros_like(img)
        for a in range(5):
            for b in range(5):
                out = out + K[a, b] * p[:, :, a:a + H, b:b + W]
        return out

    def lap(img):
        H, W = img.shape[2], img.shape[3]
        f = conv_gauss(img)
        mask = jnp.zeros((H, W), jnp.float32).at[::2, ::2].set(1.0)
        nf = f * mask[None, None] * 4.0
        return img - conv_gauss(nf)

    d = lap(x) - lap(y)
    return jnp.mean(jnp.sqrt(d * d + EPS * EPS))


if __name__ == "__main__":
    key = jax.random.PRNGKey(0)
    kx, ky = jax.random.split(key)
    N, C, H, W = 2, 1, 16, 16
    x = jax.random.normal(kx, (N, C, H, W), dtype=jnp.float32)
    y = jax.random.normal(ky, (N, C, H, W), dtype=jnp.float32)

    loss = jax.block_until_ready(macpi_loss(x, y))
    ref = _ref_macpi_loss(x, y)
    assert abs(float(loss) - float(ref)) < 2e-5, (float(loss), float(ref))
    print("KERNEL_OK")
</pallas_src>

<mosaic_0001>
module attributes {stable_mosaic.version = 11 : i64} {
  func.func @_macpi_kernel(%arg0: i32, %arg1: memref<2x16x16xf32, #tpu.memory_space<vmem>>, %arg2: memref<2x16x16xf32, #tpu.memory_space<vmem>>, %arg3: memref<16x16xf32, #tpu.memory_space<vmem>>, %arg4: memref<16x16xf32, #tpu.memory_space<vmem>>, %arg5: memref<1x1x16xf32, #tpu.memory_space<vmem>>) attributes {dimension_semantics = [#tpu.dimension_semantics<parallel>], iteration_bounds = array<i64: 1>, scalar_prefetch = 0 : i64, scratch_operands = 0 : i64, tpu.core_type = #tpu.core_type<tc>, window_params = [{transform_indices = @transform_0, window_bounds = array<i64: 2, 16, 16>}, {transform_indices = @transform_1, window_bounds = array<i64: 2, 16, 16>}, {pipeline_mode = #tpu.pipeline_mode<synchronous>, transform_indices = @transform_2, window_bounds = array<i64: 16, 16>}, {pipeline_mode = #tpu.pipeline_mode<synchronous>, transform_indices = @transform_3, window_bounds = array<i64: 16, 16>}, {transform_indices = @transform_4, window_bounds = array<i64: 1, 1, 16>}]} {
    %c0 = arith.constant 0 : index
    %c0_0 = arith.constant 0 : index
    %c0_1 = arith.constant 0 : index
    %0 = vector.load %arg1[%c0, %c0_0, %c0_1] : memref<2x16x16xf32, #tpu.memory_space<vmem>>, vector<2x16x16xf32>
    %c0_2 = arith.constant 0 : index
    %c0_3 = arith.constant 0 : index
    %c0_4 = arith.constant 0 : index
    %1 = vector.load %arg2[%c0_2, %c0_3, %c0_4] : memref<2x16x16xf32, #tpu.memory_space<vmem>>, vector<2x16x16xf32>
    %2 = arith.subf %0, %1 : vector<2x16x16xf32>
    %c0_5 = arith.constant 0 : index
    %c0_6 = arith.constant 0 : index
    %3 = vector.load %arg4[%c0_5, %c0_6] : memref<16x16xf32, #tpu.memory_space<vmem>>, vector<16x16xf32>
    "tpu.trace_start"() <{level = 10 : i32, message = "bhv,vw->bhw"}> : () -> ()
    %cst = arith.constant dense<0.000000e+00> : vector<2x16x16xf32>
    %4 = tpu.matmul %2, %3, %cst {dimension_numbers = #tpu.dot_dimension_numbers<[2], [0], [0, 1], [1], [0, 0, 0, 1, 1, 1], [], []>} : vector<2x16x16xf32>, vector<16x16xf32>, vector<2x16x16xf32> -> vector<2x16x16xf32>
    "tpu.trace_stop"() : () -> ()
    %c0_7 = arith.constant 0 : index
    %c0_8 = arith.constant 0 : index
    %5 = vector.load %arg3[%c0_7, %c0_8] : memref<16x16xf32, #tpu.memory_space<vmem>>, vector<16x16xf32>
    %6 = vector.shape_cast %5 : vector<16x16xf32> to vector<1x16x16xf32>
    %7 = vector.broadcast %6 : vector<1x16x16xf32> to vector<2x16x16xf32>
    "tpu.trace_start"() <{level = 10 : i32, message = "bhk,bkw->bhw"}> : () -> ()
    %cst_9 = arith.constant dense<0.000000e+00> : vector<2x16x16xf32>
    %8 = tpu.matmul %7, %4, %cst_9 {dimension_numbers = #tpu.dot_dimension_numbers<[2], [1], [1], [2], [0, 0, 0, 1, 1, 2], [0], [0]>} : vector<2x16x16xf32>, vector<2x16x16xf32>, vector<2x16x16xf32> -> vector<2x16x16xf32>
    "tpu.trace_stop"() : () -> ()
    %9 = arith.subf %2, %8 : vector<2x16x16xf32>
    %10 = arith.mulf %9, %9 : vector<2x16x16xf32>
    %cst_10 = arith.constant 9.99999997E-7 : f32
    %11 = vector.broadcast %cst_10 : f32 to vector<2x16x16xf32>
    %12 = arith.addf %10, %11 : vector<2x16x16xf32>
    %13 = math.sqrt %12 : vector<2x16x16xf32>
    %cst_11 = arith.constant dense<0.000000e+00> : vector<16xf32>
    %14 = vector.multi_reduction <add>, %13, %cst_11 [0, 1] : vector<2x16x16xf32> to vector<16xf32>
    %15 = vector.shape_cast %14 : vector<16xf32> to vector<1x1x16xf32>
    %c0_12 = arith.constant 0 : index
    %c0_13 = arith.constant 0 : index
    %c0_14 = arith.constant 0 : index
    %16 = vector.load %arg5[%c0_12, %c0_13, %c0_14] : memref<1x1x16xf32, #tpu.memory_space<vmem>>, vector<1x1x16xf32>
    tpu.vector_store %arg5[%c0_12, %c0_13, %c0_14], %15 {strides = array<i32>} : memref<1x1x16xf32, #tpu.memory_space<vmem>>, vector<1x1x16xf32>,
    return
  }
  func.func @transform_0(%arg0: i32) -> (i32, i32, i32) {
    %c0_i32 = arith.constant 0 : i32
    %c0_i32_0 = arith.constant 0 : i32
    %c0_i32_1 = arith.constant 0 : i32
    return %arg0, %c0_i32, %c0_i32_0 : i32, i32, i32
  }
  func.func @transform_1(%arg0: i32) -> (i32, i32, i32) {
    %c0_i32 = arith.constant 0 : i32
    %c0_i32_0 = arith.constant 0 : i32
    %c0_i32_1 = arith.constant 0 : i32
    return %arg0, %c0_i32, %c0_i32_0 : i32, i32, i32
  }
  func.func @transform_2(%arg0: i32) -> (i32, i32) {
    %c0_i32 = arith.constant 0 : i32
    %c0_i32_0 = arith.constant 0 : i32
    %c0_i32_1 = arith.constant 0 : i32
    return %c0_i32, %c0_i32_0 : i32, i32
  }
  func.func @transform_3(%arg0: i32) -> (i32, i32) {
    %c0_i32 = arith.constant 0 : i32
    %c0_i32_0 = arith.constant 0 : i32
    %c0_i32_1 = arith.constant 0 : i32
    return %c0_i32, %c0_i32_0 : i32, i32
  }
  func.func @transform_4(%arg0: i32) -> (i32, i32, i32) {
    %c0_i32 = arith.constant 0 : i32
    %c0_i32_0 = arith.constant 0 : i32
    %c0_i32_1 = arith.constant 0 : i32
    return %arg0, %c0_i32, %c0_i32_0 : i32, i32, i32
  }
}

</mosaic_0001>

<bundles_post_ra>
// kernel: tpu_custom_call.1
= control target key start
LH: loop header
LB: loop body
LE: loop exit
PB: predicated region body
PF: predicated region fallthrough
CT: control target
= control target key end

     0   :  { %9 = vsyncpa [#allocation3], 0  ;;  %s497_s0 = inlined_call_operand.hbm [shape: f32[2,16,16], index: 0, kind: input, shape index: {}]   ;;  %s498_s1 = inlined_call_operand.hbm [shape: f32[2,16,16], index: 1, kind: input, shape index: {}]   ;;  %s499_s2 = inlined_call_operand.hbm [shape: f32[16,16], index: 2, kind: input, shape index: {}]   ;;  %s500_s3 = inlined_call_operand.hbm [shape: f32[16,16], index: 3, kind: input, shape index: {}]   ;;  %s501_s4 = inlined_call_operand.hbm [shape: f32[1,1,16], index: 4, kind: output, shape index: {}]  }
   0x1   :  { %10 = vsyncpa [#allocation6], 0 }
   0x2   :  { %11 = vsyncpa [#allocation9], 0 }
   0x3   :  { %12 = vsyncpa [#allocation4], 0  ;;  %s30_s17 = sshll.u32 %s498_s1, 4  ;;  %s438_s18 = smov [#allocation5]   ;;  %s31_s17 = int_to_ptr.hbm [resolvable:$true] %s30_s17 }
   0x4   :  { %s32_s19 = sshll.u32 %s438_s18, 4  ;;  %s17_s22 = sshll.u32 %s497_s0, 4  ;;  %s33_s19 = int_to_ptr.vmem [resolvable:$true] %s32_s19  ;;  %s18_s22 = int_to_ptr.hbm [resolvable:$true] %s17_s22 }
   0x5   :  { %s439_s23 = smov 128   ;;  %s440_s24 = smov 8  }
   0x6   :  { %38 = dma.hbm_to_vmem [thread:$0]  %s31_s17, 512, %s33_s19, [#allocation6], %s439_s23, %s439_s23, %s440_s24  }
   0x7   :  { %s441_s25 = smov [#allocation2]   ;;  %s43_s29 = sshll.u32 %s499_s2, 4  ;;  %s44_s29 = int_to_ptr.hbm [resolvable:$true] %s43_s29 }
   0x8   :  { %s19_s26 = sshll.u32 %s441_s25, 4  ;;  %s56_s5 = sshll.u32 %s500_s3, 4  ;;  %s20_s26 = int_to_ptr.vmem [resolvable:$true] %s19_s26  ;;  %s57_s5 = int_to_ptr.hbm [resolvable:$true] %s56_s5 }
   0x9   :  { %25 = dma.hbm_to_vmem [thread:$0]  %s18_s22, 512, %s20_s26, [#allocation3], %s439_s23, %s439_s23, %s440_s24  }
   0xa   :  { %s442_s6 = smov [#allocation7]   ;;  %s443_s0 = smov [#allocation8]  }
   0xb   :  { %s45_s7 = sshll.u32 %s442_s6, 4  ;;  %s58_s8 = sshll.u32 %s443_s0, 4  ;;  %s46_s7 = int_to_ptr.vmem [resolvable:$true] %s45_s7  ;;  %s59_s8 = int_to_ptr.vmem [resolvable:$true] %s58_s8 }
   0xc   :  { %51 = dma.hbm_to_vmem [thread:$0]  %s44_s29, 256, %s46_s7, [#allocation6], %s439_s23, %s439_s23, %s440_s24  }
   0xd   :  { %64 = dma.hbm_to_vmem [thread:$0]  %s57_s5, 256, %s59_s8, [#allocation9], %s439_s23, %s439_s23, %s440_s24  }
   0xe   :  { %430 = dma.done.wait [#allocation3], 512  }
   0xf   :  { %431 = vsyncadd [#allocation3], 4294966784 }
  0x10   :  { %432 = dma.done.wait [#allocation6], 768  }
  0x11   :  { %433 = vsyncadd [#allocation6], 4294966528 }
  0x12   :  { %434 = dma.done.wait [#allocation9], 256  }
  0x13   :  { %435 = vsyncadd [#allocation9], 4294967040  ;;  %v94_v0 = vld [vmem:[#allocation8 + $0x8] sm:$0xff]  ;;  %v93_v1 = vld [vmem:[#allocation8] sm:$0xff]  ;;  %vm95_vm0 = vcmask 130048   ;;  %s444_s2 = smov [#allocation10]  }
  0x14   :  { %v81_v2 = vld [vmem:[#allocation2] sm:$0xff]  ;;  %122 = vmatpush.msra.mxu0 %v94_v0  ;;  %293 = vmatpush.msra.mxu3 %v94_v0  ;;  %v83_v4 = vld [vmem:[#allocation2 + $0x10] sm:$0xff]  ;;  %v82_v8 = vld [vmem:[#allocation2 + $0x8] sm:$0xff]  ;;  %s271_s3 = sshll.u32 %s444_s2, 4  ;;  %s273_s11 = sshll.u32 %s501_s4, 4  ;;  %vm264_vm9 = vcmask 122880   ;;  %s272_s3 = int_to_ptr.vmem [resolvable:$true] %s271_s3  ;;  %s274_s11 = int_to_ptr.hbm [resolvable:$true] %s273_s11 }
  0x15   :  { %v85_v3 = vld [vmem:[#allocation5] sm:$0xff]  ;;  %v87_v5 = vld [vmem:[#allocation5 + $0x10] sm:$0xff]  ;;  %v86_v9 = vld [vmem:[#allocation5 + $0x8] sm:$0xff] }
  0x16   :  { %v89_v6 = vsub.f32 %v81_v2, %v85_v3  ;;  %v91_v7 = vsub.f32 %v83_v4, %v87_v5  ;;  %123 = vmatpush.msra.mxu0 %v93_v1  ;;  %294 = vmatpush.msra.mxu3 %v93_v1  ;;  %v84_v10 = vld [vmem:[#allocation2 + $0x18] sm:$0xff]  ;;  %v90_v12 = vsub.f32 %v82_v8, %v86_v9  ;;  %v137_v17 = vld [vmem:[#allocation7] sm:$0xff]  ;;  %v138_v19 = vld [vmem:[#allocation7 + $0x8] sm:$0xff] }
  0x17   :  { %v88_v11 = vld [vmem:[#allocation5 + $0x18] sm:$0xff] }
  0x18   :  { %285 = vmatmul.msk.f32.vlgmr.msra.gmra.mxu0 %vm95_vm0, %v89_v6  ;;  %287 = vmatmul.msk.f32.vlgmr.msra.gmra.mxu3 %vm95_vm0, %v91_v7  ;;  %v92_v13 = vsub.f32 %v84_v10, %v88_v11 }
  0x20   :  { %286 = vmatmul.msk.f32.gmra.mxu0 %vm95_vm0, %v90_v12  ;;  %288 = vmatmul.msk.f32.gmra.mxu3 %vm95_vm0, %v92_v13 }
  0x95   :  { %v125_v14 = vpop.f32.mrf.mxu0 }
  0x9b   :  { %v131_v15 = vpop.f32.mrf.mxu3 }
  0x9d   :  { %v128_v16 = vpop.f32.mrf.mxu0 }
  0x9e   :  { %159 = vmatpush.msra.mxu1 %v128_v16 }
  0xa0   :  { %160 = vmatpush.msra.mxu1 %v125_v14 }
  0xa1   :  { %289 = vmatmul.msk.f32.vlgmr.msra.gmra.mxu1 %vm95_vm0, %v137_v17 }
  0xa3   :  { %v134_v18 = vpop.f32.mrf.mxu3 }
  0xa4   :  { %182 = vmatpush.msra.mxu2 %v134_v18 }
  0xa6   :  { %183 = vmatpush.msra.mxu2 %v131_v15 }
  0xa7   :  { %291 = vmatmul.msk.f32.vlgmr.msra.gmra.mxu2 %vm95_vm0, %v137_v17 }
  0xa9   :  { %290 = vmatmul.msk.f32.gmra.mxu1 %vm95_vm0, %v138_v19 }
  0xaf   :  { %292 = vmatmul.msk.f32.gmra.mxu2 %vm95_vm0, %v138_v19 }
 0x11e   :  { %v162_v20 = vpop.f32.mrf.mxu1 }
 0x11f   :  { %v191_v21 = vsub.f32 %v89_v6, %v162_v20 }
 0x121   :  { %v195_v22 = vmul.f32 %v191_v21, %v191_v21 }
 0x123   :  { %v199_v23 = vadd.f32 1e-06, %v195_v22 }
 0x125   :  { %302 = vrsqrt.f32 %v199_v23  ;;  %vm210_vm2 = vcmp.eq.f32.partialorder %v199_v23, inf  ;;  %v213_v1 = vand.u32 2147483648, %v199_v23  ;;  %vm212_vm5 = vcmp.eq.f32.partialorder %v199_v23, 0.0 }
 0x126   :  { %v165_v24 = vpop.f32.mrf.mxu1 }
 0x127   :  { %v192_v25 = vsub.f32 %v90_v12, %v165_v24 }
 0x129   :  { %v196_v26 = vmul.f32 %v192_v25, %v192_v25 }
 0x12a   :  { %v185_v27 = vpop.f32.mrf.mxu2 }
 0x12b   :  { %v303_v28 = vpop.eup %302  ;;  %v200_v29 = vadd.f32 1e-06, %v196_v26  ;;  %v193_v30 = vsub.f32 %v91_v7, %v185_v27 }
 0x12c   :  { %v204_v31 = vmul.f32 %v303_v28, %v199_v23 }
 0x12d   :  { %304 = vrsqrt.f32 %v200_v29  ;;  %v197_v32 = vmul.f32 %v193_v30, %v193_v30  ;;  %vm222_vm1 = vcmp.eq.f32.partialorder %v200_v29, inf  ;;  %v225_v61 = vand.u32 2147483648, %v200_v29 }
 0x12e   :  { %v205_v34 = vmul.f32 %v303_v28, %v204_v31  ;;  %vm224_vm4 = vcmp.eq.f32.partialorder %v200_v29, 0.0 }
 0x12f   :  { %v201_v33 = vadd.f32 1e-06, %v197_v32 }
 0x130   :  { %v206_v38 = vmul.f32 0.5, %v205_v34 }
 0x131   :  { %306 = vrsqrt.f32 %v201_v33  ;;  %vm234_vm3 = vcmp.eq.f32.partialorder %v201_v33, inf  ;;  %v237_v3 = vand.u32 2147483648, %v201_v33  ;;  %vm236_vm6 = vcmp.eq.f32.partialorder %v201_v33, 0.0 }
 0x132   :  { %v188_v35 = vpop.f32.mrf.mxu2  ;;  %v207_v44 = vsub.f32 1.5, %v206_v38 }
 0x133   :  { %v305_v36 = vpop.eup %304  ;;  %v194_v37 = vsub.f32 %v92_v13, %v188_v35 }
 0x134   :  { %v216_v39 = vmul.f32 %v305_v36, %v200_v29  ;;  %v208_v49 = vmul.f32 %v303_v28, %v207_v44 }
 0x135   :  { %v198_v40 = vmul.f32 %v194_v37, %v194_v37 }
 0x136   :  { %v217_v41 = vmul.f32 %v305_v36, %v216_v39  ;;  %v209_v55 = vmul.f32 %v208_v49, %v199_v23 }
 0x137   :  { %v307_v42 = vpop.eup %306  ;;  %v202_v43 = vadd.f32 1e-06, %v198_v40 }
 0x138   :  { %v218_v45 = vmul.f32 0.5, %v217_v41  ;;  %v228_v46 = vmul.f32 %v307_v42, %v201_v33  ;;  %v211_v62 = vsel %vm210_vm2, %v199_v23, %v209_v55 }
 0x139   :  { %308 = vrsqrt.f32 %v202_v43  ;;  %v214_v5 = vsel %vm212_vm5, %v213_v1, %v211_v62  ;;  %vm246_vm7 = vcmp.eq.f32.partialorder %v202_v43, inf  ;;  %v249_v12 = vand.u32 2147483648, %v202_v43 }
 0x13a   :  { %v219_v47 = vsub.f32 1.5, %v218_v45  ;;  %v229_v48 = vmul.f32 %v307_v42, %v228_v46  ;;  %v251_v10 = vsel %vm95_vm0, %v214_v5, 0.0  ;;  %vm248_vm8 = vcmp.eq.f32.partialorder %v202_v43, 0.0 }
 0x13c   :  { %v220_v50 = vmul.f32 %v305_v36, %v219_v47  ;;  %v230_v51 = vmul.f32 0.5, %v229_v48 }
 0x13e   :  { %v221_v52 = vmul.f32 %v220_v50, %v200_v29  ;;  %v231_v53 = vsub.f32 1.5, %v230_v51 }
 0x13f   :  { %v309_v54 = vpop.eup %308 }
 0x140   :  { %v240_v56 = vmul.f32 %v309_v54, %v202_v43  ;;  %v232_v57 = vmul.f32 %v307_v42, %v231_v53  ;;  %v223_v58 = vsel %vm222_vm1, %v200_v29, %v221_v52 }
 0x141   :  { %v226_v2 = vsel %vm224_vm4, %v225_v61, %v223_v58 }
 0x142   :  { %v233_v59 = vmul.f32 %v232_v57, %v201_v33  ;;  %v241_v60 = vmul.f32 %v309_v54, %v240_v56  ;;  %v252_v8 = vsel %vm95_vm0, %v226_v2, 0.0 }
 0x143   :  { %v253_v13 = vadd.f32 %v252_v8, %v251_v10 }
 0x144   :  { %v235_v63 = vsel %vm234_vm3, %v201_v33, %v233_v59  ;;  %v242_v0 = vmul.f32 0.5, %v241_v60 }
 0x145   :  { %v238_v6 = vsel %vm236_vm6, %v237_v3, %v235_v63 }
 0x146   :  { %v243_v4 = vsub.f32 1.5, %v242_v0  ;;  %v254_v11 = vsel %vm95_vm0, %v238_v6, 0.0 }
 0x147   :  { %v255_v16 = vadd.f32 %v254_v11, %v253_v13 }
 0x148   :  { %v244_v7 = vmul.f32 %v309_v54, %v243_v4 }
 0x14a   :  { %v245_v9 = vmul.f32 %v244_v7, %v202_v43 }
 0x14c   :  { %v247_v14 = vsel %vm246_vm7, %v202_v43, %v245_v9 }
 0x14d   :  { %v250_v15 = vsel %vm248_vm8, %v249_v12, %v247_v14 }
 0x14e   :  { %v256_v17 = vsel %vm95_vm0, %v250_v15, 0.0 }
 0x14f   :  { %v257_v18 = vadd.f32 %v256_v17, %v255_v16 }
 0x151   :  { %v258_v19 = vrot.slane %v257_v18, 4 }
 0x153   :  { %v259_v20 = vadd.f32 %v258_v19, %v257_v18 }
 0x155   :  { %v260_v21 = vrot.slane %v259_v20, 2 }
 0x157   :  { %v261_v22 = vadd.f32 %v260_v21, %v259_v20 }
 0x159   :  { %v262_v23 = vrot.slane %v261_v22, 1 }
 0x15b   :  { %v263_v24 = vadd.f32 %v262_v23, %v261_v22 }
 0x15d   :  { %265 = vst.msk [vmem:[#allocation10] sm:$0x1] %vm264_vm9, %v263_v24 }
 0x15e   :  { %276 = dma.vmem_to_hbm [thread:$0]  %s272_s3, 16, %s274_s11, [#allocation4]  }
 0x15f   :  { %436 = dma.done.wait [#allocation4], 16  }
 0x160   :  { %437 = vsyncadd [#allocation4], 4294967280 }
 0x161   :  { %281 = vsyncpa [#allocation3], 1 }
 0x162   :  { %282 = vsyncpa [#allocation6], 1 }
 0x163   :  { %283 = vsyncpa [#allocation9], 1 }
 0x164   :  { %284 = vsyncpa [#allocation4], 1 }

</bundles_post_ra>
